<compile_context>
chip_gen: v5e
topology: v5e:2x2
jax: 0.10.0
libtpu: 0.0.40
codegen_flags: <defaults>
</compile_context>

<pallas_src>
import functools

import jax
import jax.numpy as jnp
from jax.experimental import pallas as pl
from jax.experimental.pallas import tpu as pltpu


# ----------------------------- Pallas kernel -------------------------------

def dgi_fused_kernel(a_ref, xp_ref, w1_ref, b1_ref, w2_ref, b2_ref,
                     wbt_ref, bias_ref, pos_ref, neg_ref, *, out_c: int):
    """Fused DGI forward.

    Inputs (clean and corrupted passes lane-packed, weights block-diagonal):
      a_ref    : (N, N)          normalized adjacency A_hat
      xp_ref   : (N, 2*IN)       [X | X[perm]]
      w1_ref   : (2*IN, 2*HID)   blockdiag(W1, W1)
      b1_ref   : (1, 2*HID)      [b1 | b1]
      w2_ref   : (2*HID, 2*OUT)  blockdiag(W2, W2)
      b2_ref   : (1, 2*OUT)      [b2 | b2]
      wbt_ref  : (OUT, OUT)      W_bilinear^T (pre-transposed in wrapper)
      bias_ref : (1, 1) SMEM     bilinear bias (scalar)
    Outputs:
      pos_ref  : (N, 1)
      neg_ref  : (N, 1)
    """
    a = a_ref[...]

    # ---- GCN layer 1 (clean + corrupted in one matmul) ----
    xw1 = jnp.dot(xp_ref[...], w1_ref[...], preferred_element_type=jnp.float32)
    h1 = jnp.dot(a, xw1, preferred_element_type=jnp.float32) + b1_ref[...]
    h1 = jnp.maximum(h1, 0.0)                                   # (N, 2*HID)

    # ---- GCN layer 2 ----
    xw2 = jnp.dot(h1, w2_ref[...], preferred_element_type=jnp.float32)
    h2 = jnp.dot(a, xw2, preferred_element_type=jnp.float32) + b2_ref[...]
    # split the lane-packed result back into clean / corrupted embeddings
    h = h2[:, :out_c]                                           # (N, OUT)
    hc = h2[:, out_c:]                                          # (N, OUT)

    # ---- readout: s = sigmoid(mean over nodes of clean H) ----
    s = jax.nn.sigmoid(jnp.mean(h, axis=0, keepdims=True))      # (1, OUT)

    # ---- bilinear discriminator: score_i = h_i . (W_b s) + bias ----
    v = jnp.dot(s, wbt_ref[...], preferred_element_type=jnp.float32)  # (1, OUT)
    bias = bias_ref[0, 0]
    pos_ref[...] = jnp.sum(h * v, axis=-1, keepdims=True) + bias
    neg_ref[...] = jnp.sum(hc * v, axis=-1, keepdims=True) + bias


# ------------------------------ JAX wrappers --------------------------------

_VMEM = pl.BlockSpec(memory_space=pltpu.MemorySpace.VMEM)
_SMEM = pl.BlockSpec(memory_space=pltpu.MemorySpace.SMEM)


def _block_diag2(w):
    """blockdiag(w, w) built in plain JAX glue (free layout plumbing)."""
    z = jnp.zeros_like(w)
    top = jnp.concatenate([w, z], axis=1)
    bot = jnp.concatenate([z, w], axis=1)
    return jnp.concatenate([top, bot], axis=0)


def normalized_adjacency(edge_index, num_nodes):
    """Dense GCN propagation matrix: D^-1/2 (A + I) D^-1/2 (PyG GCNConv).

    Uses scatter-add so duplicate edges count with multiplicity (PyG semantics).
    """
    src, dst = edge_index[0], edge_index[1]
    a = jnp.zeros((num_nodes, num_nodes), jnp.float32)
    a = a.at[dst, src].add(1.0)                      # message flows src -> dst
    a = a + jnp.eye(num_nodes, dtype=jnp.float32)    # self loops
    deg = a.sum(axis=1)
    dinv = jax.lax.rsqrt(deg)
    return a * dinv[:, None] * dinv[None, :]


def dgi_forward(x, edge_index, params, perm):
    """Returns (pos_scores, neg_scores), each of shape (N, 1)."""
    n = x.shape[0]
    out_c = params["w2"].shape[1]

    a_hat = normalized_adjacency(edge_index, n)

    # TODO(synk): torch.randperm is nondeterministic at runtime; we use a fixed
    # deterministic permutation supplied by the caller instead.
    x_packed = jnp.concatenate([x, x[perm]], axis=1)          # (N, 2*IN)
    w1_bd = _block_diag2(params["w1"])                        # (2*IN, 2*HID)
    b1_both = jnp.concatenate([params["b1"], params["b1"]], axis=1)
    w2_bd = _block_diag2(params["w2"])                        # (2*HID, 2*OUT)
    b2_both = jnp.concatenate([params["b2"], params["b2"]], axis=1)
    wb_t = params["wb"].T                                     # (OUT, OUT)

    pos, neg = pl.pallas_call(
        functools.partial(dgi_fused_kernel, out_c=out_c),
        out_shape=(jax.ShapeDtypeStruct((n, 1), jnp.float32),
                   jax.ShapeDtypeStruct((n, 1), jnp.float32)),
        in_specs=[_VMEM, _VMEM, _VMEM, _VMEM, _VMEM, _VMEM, _VMEM, _SMEM],
        out_specs=(_VMEM, _VMEM),
    )(a_hat, x_packed, w1_bd, b1_both, w2_bd, b2_both, wb_t, params["bb"])
    return pos, neg


def _reference_forward(x, edge_index, params, perm):
    """Pure-JAX reference for correctness checking."""
    a_hat = normalized_adjacency(edge_index, x.shape[0])

    def enc(xx):
        h = jnp.maximum(a_hat @ (xx @ params["w1"]) + params["b1"], 0.0)
        return a_hat @ (h @ params["w2"]) + params["b2"]

    h = enc(x)
    hc = enc(x[perm])
    s = jax.nn.sigmoid(h.mean(axis=0, keepdims=True))
    v = s @ params["wb"].T
    pos = (h * v).sum(axis=-1, keepdims=True) + params["bb"][0, 0]
    neg = (hc * v).sum(axis=-1, keepdims=True) + params["bb"][0, 0]
    return pos, neg


# ------------------------------- main ---------------------------------------

if __name__ == "__main__":
    N = 16            # nodes
    IN_C = 8          # in_channels
    HID_C = 32        # hidden_channels
    OUT_C = 16        # out_channels (= discriminator dim d)

    key = jax.random.PRNGKey(0)
    k_x, k_w1, k_b1, k_w2, k_b2, k_wb, k_bb, k_perm = jax.random.split(key, 8)

    # deterministic parameter init (shapes follow the module's __init__)
    params = {
        "w1": jax.random.normal(k_w1, (IN_C, HID_C), jnp.float32) * 0.1,
        "b1": jax.random.normal(k_b1, (1, HID_C), jnp.float32) * 0.1,
        "w2": jax.random.normal(k_w2, (HID_C, OUT_C), jnp.float32) * 0.1,
        "b2": jax.random.normal(k_b2, (1, OUT_C), jnp.float32) * 0.1,
        "wb": jax.random.normal(k_wb, (OUT_C, OUT_C), jnp.float32) * 0.1,  # Bilinear weight[0]
        "bb": jax.random.normal(k_bb, (1, 1), jnp.float32) * 0.1,          # Bilinear bias
    }

    # node features
    x = jax.random.normal(k_x, (N, IN_C), jnp.float32)

    # deterministic ring graph (both directions), edge_index shape [2, 2N]
    idx = jnp.arange(N, dtype=jnp.int32)
    src = jnp.concatenate([idx, (idx + 1) % N])
    dst = jnp.concatenate([(idx + 1) % N, idx])
    edge_index = jnp.stack([src, dst], axis=0)

    # deterministic corruption permutation (stands in for torch.randperm)
    perm = jax.random.permutation(k_perm, N)

    pos_scores, neg_scores = dgi_forward(x, edge_index, params, perm)
    jax.block_until_ready((pos_scores, neg_scores))

    assert pos_scores.shape == (N, 1) and neg_scores.shape == (N, 1)
    assert jnp.all(jnp.isfinite(pos_scores)) and jnp.all(jnp.isfinite(neg_scores))

    # correctness vs. pure-JAX reference
    ref_pos, ref_neg = _reference_forward(x, edge_index, params, perm)
    assert jnp.allclose(pos_scores, ref_pos, rtol=1e-3, atol=1e-3)
    assert jnp.allclose(neg_scores, ref_neg, rtol=1e-3, atol=1e-3)

    print("KERNEL_OK")
</pallas_src>

<mosaic_0001>
module attributes {stable_mosaic.version = 11 : i64} {
  func.func @dgi_fused_kernel(%arg0: memref<16x16xf32, #tpu.memory_space<vmem>>, %arg1: memref<16x16xf32, #tpu.memory_space<vmem>>, %arg2: memref<16x64xf32, #tpu.memory_space<vmem>>, %arg3: memref<1x64xf32, #tpu.memory_space<vmem>>, %arg4: memref<64x32xf32, #tpu.memory_space<vmem>>, %arg5: memref<1x32xf32, #tpu.memory_space<vmem>>, %arg6: memref<16x16xf32, #tpu.memory_space<vmem>>, %arg7: memref<1x1xf32, #tpu.memory_space<smem>>, %arg8: memref<16x1xf32, #tpu.memory_space<vmem>>, %arg9: memref<16x1xf32, #tpu.memory_space<vmem>>) attributes {dimension_semantics = [], scalar_prefetch = 0 : i64, scratch_operands = 0 : i64, tpu.core_type = #tpu.core_type<tc>} {
    %c0 = arith.constant 0 : index
    %c0_0 = arith.constant 0 : index
    %0 = vector.load %arg0[%c0, %c0_0] : memref<16x16xf32, #tpu.memory_space<vmem>>, vector<16x16xf32>
    %c0_1 = arith.constant 0 : index
    %c0_2 = arith.constant 0 : index
    %1 = vector.load %arg1[%c0_1, %c0_2] : memref<16x16xf32, #tpu.memory_space<vmem>>, vector<16x16xf32>
    %c0_3 = arith.constant 0 : index
    %c0_4 = arith.constant 0 : index
    %2 = vector.load %arg2[%c0_3, %c0_4] : memref<16x64xf32, #tpu.memory_space<vmem>>, vector<16x64xf32>
    %cst = arith.constant dense<0.000000e+00> : vector<16x64xf32>
    %3 = tpu.matmul %1, %2, %cst {dimension_numbers = #tpu.dot_dimension_numbers<[1], [0], [0], [1], [0, 0, 1, 1], [], []>} : vector<16x16xf32>, vector<16x64xf32>, vector<16x64xf32> -> vector<16x64xf32>
    %cst_5 = arith.constant dense<0.000000e+00> : vector<16x64xf32>
    %4 = tpu.matmul %0, %3, %cst_5 {dimension_numbers = #tpu.dot_dimension_numbers<[1], [0], [0], [1], [0, 0, 1, 1], [], []>} : vector<16x16xf32>, vector<16x64xf32>, vector<16x64xf32> -> vector<16x64xf32>
    %c0_6 = arith.constant 0 : index
    %c0_7 = arith.constant 0 : index
    %5 = vector.load %arg3[%c0_6, %c0_7] : memref<1x64xf32, #tpu.memory_space<vmem>>, vector<1x64xf32>
    %6 = vector.broadcast %5 : vector<1x64xf32> to vector<16x64xf32>
    %7 = arith.addf %4, %6 : vector<16x64xf32>
    %cst_8 = arith.constant 0.000000e+00 : f32
    %8 = vector.broadcast %cst_8 : f32 to vector<16x64xf32>
    %9 = arith.maximumf %7, %8 : vector<16x64xf32>
    %c0_9 = arith.constant 0 : index
    %c0_10 = arith.constant 0 : index
    %10 = vector.load %arg4[%c0_9, %c0_10] : memref<64x32xf32, #tpu.memory_space<vmem>>, vector<64x32xf32>
    %cst_11 = arith.constant dense<0.000000e+00> : vector<16x32xf32>
    %11 = tpu.matmul %9, %10, %cst_11 {dimension_numbers = #tpu.dot_dimension_numbers<[1], [0], [0], [1], [0, 0, 1, 1], [], []>} : vector<16x64xf32>, vector<64x32xf32>, vector<16x32xf32> -> vector<16x32xf32>
    %cst_12 = arith.constant dense<0.000000e+00> : vector<16x32xf32>
    %12 = tpu.matmul %0, %11, %cst_12 {dimension_numbers = #tpu.dot_dimension_numbers<[1], [0], [0], [1], [0, 0, 1, 1], [], []>} : vector<16x16xf32>, vector<16x32xf32>, vector<16x32xf32> -> vector<16x32xf32>
    %c0_13 = arith.constant 0 : index
    %c0_14 = arith.constant 0 : index
    %13 = vector.load %arg5[%c0_13, %c0_14] : memref<1x32xf32, #tpu.memory_space<vmem>>, vector<1x32xf32>
    %14 = vector.broadcast %13 : vector<1x32xf32> to vector<16x32xf32>
    %15 = arith.addf %12, %14 : vector<16x32xf32>
    %16 = vector.extract_strided_slice %15 {offsets = [0, 0], sizes = [16, 16], strides = [1, 1]} : vector<16x32xf32> to vector<16x16xf32>
    %17 = vector.extract_strided_slice %15 {offsets = [0, 16], sizes = [16, 16], strides = [1, 1]} : vector<16x32xf32> to vector<16x16xf32>
    %cst_15 = arith.constant dense<0.000000e+00> : vector<16xf32>
    %18 = vector.multi_reduction <add>, %16, %cst_15 [0] : vector<16x16xf32> to vector<16xf32>
    %19 = vector.shape_cast %18 : vector<16xf32> to vector<1x16xf32>
    %cst_16 = arith.constant 1.600000e+01 : f32
    %20 = vector.broadcast %cst_16 : f32 to vector<1x16xf32>
    %21 = arith.divf %19, %20 : vector<1x16xf32>
    %22 = arith.negf %21 : vector<1x16xf32>
    %23 = math.exp %22 : vector<1x16xf32>
    %cst_17 = arith.constant 1.000000e+00 : f32
    %24 = vector.broadcast %cst_17 : f32 to vector<1x16xf32>
    %25 = arith.addf %24, %23 : vector<1x16xf32>
    %26 = arith.divf %24, %25 : vector<1x16xf32>
    %c0_18 = arith.constant 0 : index
    %c0_19 = arith.constant 0 : index
    %27 = vector.load %arg6[%c0_18, %c0_19] : memref<16x16xf32, #tpu.memory_space<vmem>>, vector<16x16xf32>
    %cst_20 = arith.constant dense<0.000000e+00> : vector<1x16xf32>
    %28 = tpu.matmul %26, %27, %cst_20 {dimension_numbers = #tpu.dot_dimension_numbers<[1], [0], [0], [1], [0, 0, 1, 1], [], []>} : vector<1x16xf32>, vector<16x16xf32>, vector<1x16xf32> -> vector<1x16xf32>
    %c0_21 = arith.constant 0 : index
    %c0_22 = arith.constant 0 : index
    %29 = memref.load %arg7[%c0_21, %c0_22] : memref<1x1xf32, #tpu.memory_space<smem>>
    %30 = vector.broadcast %28 : vector<1x16xf32> to vector<16x16xf32>
    %31 = arith.mulf %16, %30 : vector<16x16xf32>
    %cst_23 = arith.constant dense<0.000000e+00> : vector<16xf32>
    %32 = vector.multi_reduction <add>, %31, %cst_23 [1] : vector<16x16xf32> to vector<16xf32>
    %33 = vector.shape_cast %32 : vector<16xf32> to vector<16x1xf32>
    %34 = vector.broadcast %29 : f32 to vector<16x1xf32>
    %35 = arith.addf %33, %34 : vector<16x1xf32>
    %c0_24 = arith.constant 0 : index
    %c0_25 = arith.constant 0 : index
    %36 = vector.load %arg8[%c0_24, %c0_25] : memref<16x1xf32, #tpu.memory_space<vmem>>, vector<16x1xf32>
    tpu.vector_store %arg8[%c0_24, %c0_25], %35 {strides = array<i32>} : memref<16x1xf32, #tpu.memory_space<vmem>>, vector<16x1xf32>,
    %37 = vector.broadcast %28 : vector<1x16xf32> to vector<16x16xf32>
    %38 = arith.mulf %17, %37 : vector<16x16xf32>
    %cst_26 = arith.constant dense<0.000000e+00> : vector<16xf32>
    %39 = vector.multi_reduction <add>, %38, %cst_26 [1] : vector<16x16xf32> to vector<16xf32>
    %40 = vector.shape_cast %39 : vector<16xf32> to vector<16x1xf32>
    %41 = vector.broadcast %29 : f32 to vector<16x1xf32>
    %42 = arith.addf %40, %41 : vector<16x1xf32>
    %c0_27 = arith.constant 0 : index
    %c0_28 = arith.constant 0 : index
    %43 = vector.load %arg9[%c0_27, %c0_28] : memref<16x1xf32, #tpu.memory_space<vmem>>, vector<16x1xf32>
    tpu.vector_store %arg9[%c0_27, %c0_28], %42 {strides = array<i32>} : memref<16x1xf32, #tpu.memory_space<vmem>>, vector<16x1xf32>,
    return
  }
}

</mosaic_0001>

<bundles_post_ra>
// kernel: tpu_custom_call.1
= control target key start
LH: loop header
LB: loop body
LE: loop exit
PB: predicated region body
PF: predicated region fallthrough
CT: control target
= control target key end

     0   :  { %vm38_vm0 = vcmask 130048   ;;  %vm111_vm1 = vcmask 523264   ;;  %v306_v25 = vmov 16.0   ;;  %s308_s19 = smov 112   ;;  %vm242_vm7 = vcmask 7168   ;;  %s450_s2 = inlined_call_operand.vmem [shape: f32[16,64], index: 2, kind: input, shape index: {}]   ;;  %s451_s1 = inlined_call_operand.vmem [shape: f32[16,16], index: 1, kind: input, shape index: {}]   ;;  %s452_s3 = inlined_call_operand.vmem [shape: f32[1,64], index: 3, kind: input, shape index: {}]   ;;  %s453_s4 = inlined_call_operand.vmem [shape: f32[64,32], index: 4, kind: input, shape index: {}]   ;;  %s454_s0 = inlined_call_operand.vmem [shape: f32[16,16], index: 0, kind: input, shape index: {}]   ;;  %s455_s5 = inlined_call_operand.vmem [shape: f32[1,32], index: 5, kind: input, shape index: {}]   ;;  %s456_s6 = inlined_call_operand.vmem [shape: f32[16,16], index: 6, kind: input, shape index: {}]   ;;  %s457_s7 = inlined_call_operand.<no memory space> [shape: f32[1,1], index: 7, kind: input, shape index: {}]   ;;  %s458_s8 = inlined_call_operand.vmem [shape: f32[16,1], index: 8, kind: output, shape index: {0}]   ;;  %s459_s9 = inlined_call_operand.vmem [shape: f32[16,1], index: 9, kind: output, shape index: {1}]  }
   0x1   :  { %v37_v0 = vld [vmem:[%s450_s2 + $0x8] sm:$0xff]  ;;  %v36_v1 = vld [vmem:[%s450_s2] sm:$0xff]  ;;  %v110_v4 = vld [vmem:[%s453_s4 + $0x38] sm:$0xff]  ;;  %300 = vrcp.f32 %v306_v25 }
   0x2   :  { %59 = vmatpush.msra.mxu0 %v37_v0  ;;  %v34_v2 = vld [vmem:[%s451_s1] sm:$0xff]  ;;  %v35_v3 = vld [vmem:[%s451_s1 + $0x8] sm:$0xff]  ;;  %287 = vmatpush.msra.mxu2 %v110_v4  ;;  %v109_v5 = vld [vmem:[%s453_s4 + $0x30] sm:$0xff] }
   0x3   :  { %v108_v6 = vld [vmem:[%s453_s4 + $0x28] sm:$0xff]  ;;  %v107_v7 = vld [vmem:[%s453_s4 + $0x20] sm:$0xff]  ;;  %v106_v8 = vld [vmem:[%s453_s4 + $0x18] sm:$0xff] }
   0x4   :  { %60 = vmatpush.msra.mxu0 %v36_v1  ;;  %288 = vmatpush.msra.mxu2 %v109_v5  ;;  %v32_v11 = vld [vmem:[%s454_s0] sm:$0xff]  ;;  %v33_v12 = vld [vmem:[%s454_s0 + $0x8] sm:$0xff]  ;;  %v105_v13 = vld [vmem:[%s453_s4 + $0x10] sm:$0xff] }
   0x5   :  { %277 = vmatmul.msk.f32.vlgmr.msra.gmra.mxu0 %vm38_vm0, %v34_v2  ;;  %v104_v14 = vld [vmem:[%s453_s4 + $0x8] sm:$0xff]  ;;  %v103_v15 = vld [vmem:[%s453_s4] sm:$0xff] }
   0x6   :  { %289 = vmatpush.msra.mxu2 %v108_v6  ;;  %v298_v16 = vld [vmem:[%s452_s3] ss:$0 sm:$0xff]  ;;  %v205_v31 = vld [vmem:[%s456_s6 + $0x8] sm:$0xff] }
   0x7   :  { %v299_v27 = vld [vmem:[%s455_s5] ss:$0 sm:$0xff]  ;;  %v301_v28 = vpop.eup %300  ;;  %223 = vmatpush.msrb.mxu0 %v205_v31  ;;  %s307_s5 = smov 16  }
   0x8   :  { %290 = vmatpush.msra.mxu2 %v107_v7  ;;  %v178_v30 = vmul.f32 16.0, %v301_v28  ;;  %v204_v32 = vld [vmem:[%s456_s6] sm:$0xff]  ;;  %vm182_vm2 = vweird.f32 %v301_v28 }
   0x9   :  { %224 = vmatpush.msrb.mxu0 %v204_v32 }
   0xa   :  { %291 = vmatpush.msra.mxu2 %v106_v8  ;;  %v179_v37 = vsub.f32 1.0, %v178_v30 }
   0xc   :  { %292 = vmatpush.msra.mxu2 %v105_v13  ;;  %v180_v40 = vmul.f32 %v301_v28, %v179_v37 }
   0xd   :  { %278 = vmatmul.msk.f32.gmra.mxu0 %vm38_vm0, %v35_v3 }
   0xe   :  { %293 = vmatpush.msra.mxu2 %v104_v14  ;;  %v181_v43 = vadd.f32 %v301_v28, %v180_v40 }
  0x10   :  { %294 = vmatpush.msra.mxu2 %v103_v15  ;;  %v183_v46 = vsel %vm182_vm2, %v301_v28, %v181_v43 }
  0x82   :  { %v62_v9 = vpop.f32.mrf.mxu0 }
  0x8a   :  { %v65_v10 = vpop.f32.mrf.mxu0 }
  0x8b   :  { %92 = vmatpush.msra.mxu1 %v65_v10 }
  0x8d   :  { %93 = vmatpush.msra.mxu1 %v62_v9 }
  0x8e   :  { %279 = vmatmul.msk.f32.vlgmr.msra.gmra.mxu1 %vm38_vm0, %v32_v11 }
  0x8f   :  { %126 = vmatpush.msrb.mxu1 %v110_v4 }
  0x91   :  { %127 = vmatpush.msrb.mxu1 %v109_v5  ;;  %v239_v5 = vstv %s457_s7 }
  0x93   :  { %128 = vmatpush.msrb.mxu1 %v108_v6 }
  0x95   :  { %129 = vmatpush.msrb.mxu1 %v107_v7 }
  0x96   :  { %280 = vmatmul.msk.f32.gmra.mxu1 %vm38_vm0, %v33_v12 }
  0x97   :  { %130 = vmatpush.msrb.mxu1 %v106_v8 }
  0x99   :  { %131 = vmatpush.msrb.mxu1 %v105_v13 }
  0x9b   :  { %132 = vmatpush.msrb.mxu1 %v104_v14 }
  0x9d   :  { %133 = vmatpush.msrb.mxu1 %v103_v15 }
 0x10b   :  { %v95_v17 = vpop.f32.mrf.mxu1 }
 0x10c   :  { %v96_v18 = vadd.f32 %v298_v16, %v95_v17 }
 0x10e   :  { %v101_v19 = vmax.f32 %v96_v18, 0.0 }
 0x110   :  { %281 = vmatmul.msk.f32.vlgmr.msrb.gmra.mxu1 %vm111_vm1, %v101_v19 }
 0x113   :  { %v98_v20 = vpop.f32.mrf.mxu1 }
 0x114   :  { %v99_v21 = vadd.f32 %v298_v16, %v98_v20 }
 0x116   :  { %v102_v22 = vmax.f32 %v99_v21, 0.0 }
 0x118   :  { %282 = vmatmul.msk.f32.vlgmr.msra.gmra.mxu2 %vm111_vm1, %v102_v22 }
 0x18d   :  { %v135_v24 = vpop.f32.mrf.mxu1 }
 0x19b   :  { %v138_v23 = vpop.f32.mrf.mxu2 }
 0x19c   :  { %159 = vmatpush.msra.mxu3 %v138_v23 }
 0x19e   :  { %160 = vmatpush.msra.mxu3 %v135_v24 }
 0x19f   :  { %283 = vmatmul.msk.f32.vlgmr.msra.gmra.mxu3 %vm38_vm0, %v32_v11 }
 0x1a7   :  { %284 = vmatmul.msk.f32.gmra.mxu3 %vm38_vm0, %v33_v12 }
 0x222   :  { %v162_v26 = vpop.f32.mrf.mxu3 }
 0x223   :  { %v413_v29 = vadd.f32 %v299_v27, %v162_v26 }
 0x225   :  { %v168_v35 = vsel %vm38_vm0, %v413_v29, 0.0 }
 0x22a   :  { %v165_v33 = vpop.f32.mrf.mxu3 }
 0x22b   :  { %v166_v34 = vadd.f32 %v299_v27, %v165_v33 }
 0x22d   :  { %v169_v36 = vsel %vm38_vm0, %v166_v34, 0.0 }
 0x22e   :  { %v170_v38 = vadd.f32 %v169_v36, %v168_v35 }
 0x230   :  { %v171_v39 = vrot.slane %v170_v38, 4 }
 0x232   :  { %v172_v41 = vadd.f32 %v171_v39, %v170_v38 }
 0x234   :  { %v173_v42 = vrot.slane %v172_v41, 2 }
 0x236   :  { %v174_v44 = vadd.f32 %v173_v42, %v172_v41 }
 0x238   :  { %v175_v45 = vrot.slane %v174_v44, 1 }
 0x23a   :  { %v176_v47 = vadd.f32 %v175_v45, %v174_v44 }
 0x23c   :  { %v184_v48 = vmul.f32 %v183_v46, %v176_v47 }
 0x23e   :  { %v285_v49 = vmul.f32 -1.442695, %v184_v48 }
 0x240   :  { %302 = vpow2.f32 %v285_v49 }
 0x246   :  { %v303_v50 = vpop.eup %302 }
 0x247   :  { %v188_v51 = vadd.f32 1.0, %v303_v50 }
 0x249   :  { %304 = vrcp.f32 %v188_v51  ;;  %v200_v55 = vand.u32 2147483648, %v188_v51  ;;  %v198_v57 = vand.u32 2147483647, %v188_v51  ;;  %vm194_vm4 = vweird.f32 %v188_v51 }
 0x24b   :  { %v201_v59 = vor.u32 1.1754944e-38, %v200_v55  ;;  %vm199_vm6 = vcmp.eq.f32.partialorder %v198_v57, 8.507059e+37 }
 0x24f   :  { %v305_v52 = vpop.eup %304 }
 0x250   :  { %v190_v53 = vmul.f32 %v305_v52, %v188_v51  ;;  %vm195_vm3 = vweird.f32 %v305_v52 }
 0x251   :  { %vm196_vm5 = vmor %vm194_vm4, %vm195_vm3 }
 0x252   :  { %v191_v54 = vsub.f32 1.0, %v190_v53 }
 0x254   :  { %v192_v56 = vmul.f32 %v305_v52, %v191_v54 }
 0x256   :  { %v193_v58 = vadd.f32 %v305_v52, %v192_v56 }
 0x258   :  { %v197_v60 = vsel %vm196_vm5, %v305_v52, %v193_v58 }
 0x259   :  { %v202_v61 = vsel %vm199_vm6, %v201_v59, %v197_v60 }
 0x25a   :  { %286 = vmatmul.msk.f32.vlgmr.msrb.gmra.mxu0 %vm38_vm0, %v202_v61 }
 0x2d7   :  { %v226_v62 = vpop.f32.mrf.mxu0 }
 0x2d8   :  { %v230_v63 = vperm.slane %v226_v62, 0 }
 0x2da   :  { %246 = vrot.lane.b32.xlu0 %v230_v63, %s307_s5  ;;  %v232_v0 = vmul.f32 %v230_v63, %v166_v34  ;;  %v231_v8 = vmul.f32 %v230_v63, %v413_v29 }
 0x2dc   :  { %v236_v1 = vsel %vm38_vm0, %v232_v0, 0.0  ;;  %v233_v9 = vsel %vm38_vm0, %v231_v8, 0.0 }
 0x2dd   :  { %237 = vadd.xlane.f32.xlu2 %v236_v1 }
 0x34c   :  { %v247_v2 = vpop.permute.xlu0 %246 }
 0x34d   :  { %v249_v3 = vmul.f32 %v247_v2, %v413_v29  ;;  %v250_v4 = vmul.f32 %v247_v2, %v166_v34 }
 0x34f   :  { %255 = vrot.lane.b32.xlu1 %v250_v4, %s308_s19  ;;  %253 = vrot.lane.b32.xlu0 %v249_v3, %s308_s19 }
 0x350   :  { %v238_v6 = vpop.xlane.xlu2 %237 }
 0x351   :  { %v241_v7 = vadd.f32 %v239_v5, %v238_v6 }
 0x353   :  { %244 = vst.msk [vmem:[%s458_s8 + $0x8] sm:$0xff] %vm242_vm7, %v241_v7 }
 0x379   :  { %234 = vadd.xlane.f32.xlu1 %v233_v9 }
 0x3c1   :  { %v256_v10 = vpop.permute.xlu1 %255  ;;  %v254_v11 = vpop.permute.xlu0 %253 }
 0x3c2   :  { %v262_v12 = vsel %vm38_vm0, %v256_v10, 0.0  ;;  %v259_v13 = vsel %vm38_vm0, %v254_v11, 0.0 }
 0x3c3   :  { %263 = vadd.xlane.f32.xlu0 %v262_v12  ;;  %260 = vadd.xlane.f32.xlu2 %v259_v13 }
 0x3ec   :  { %v235_v14 = vpop.xlane.xlu1 %234 }
 0x3ed   :  { %v240_v15 = vadd.f32 %v239_v5, %v235_v14 }
 0x3ef   :  { %243 = vst.msk [vmem:[%s458_s8] sm:$0xff] %vm242_vm7, %v240_v15 }
 0x436   :  { %v264_v16 = vpop.xlane.xlu0 %263  ;;  %v261_v17 = vpop.xlane.xlu2 %260 }
 0x437   :  { %v266_v18 = vadd.f32 %v264_v16, %v239_v5  ;;  %v265_v19 = vadd.f32 %v261_v17, %v239_v5 }
 0x439   :  { %268 = vst.msk [vmem:[%s459_s9 + $0x8] sm:$0xff] %vm242_vm7, %v266_v18 }
 0x43a   :  { %267 = vst.msk [vmem:[%s459_s9] sm:$0xff] %vm242_vm7, %v265_v19 }

</bundles_post_ra>
